<compile_context>
chip_gen: v5e
topology: v5e:2x2
jax: 0.10.0
libtpu: 0.0.40
codegen_flags: <defaults>
</compile_context>

<pallas_src>
import math

import jax
import jax.numpy as jnp
from jax.experimental import pallas as pl
from jax.experimental.pallas import tpu as pltpu


def _round_up(x, m):
    return ((x + m - 1) // m) * m


def utility_kernel(w_ref, xT_ref, o_ref):
    # w_ref : (Sp, Kp)  resident augmented utility matrix (num_set on sublanes).
    # xT_ref: (Kp, tm)  transposed activation tile (K on sublanes, batch on lanes).
    # o_ref : (Sp, tm)  transposed output tile -> lane-dense stores.
    o_ref[...] = jnp.dot(
        w_ref[...],
        xT_ref[...],
        preferred_element_type=jnp.float32,
        precision=jax.lax.Precision.HIGHEST,
    ).astype(o_ref.dtype)


def dm_set_test_forward(inputs, utility_matrix, nu, *, tm=1024):
    """Pallas equivalent of DM_set_test.forward.

    inputs:         (B, C) with C >= num_class + 1 (uses cols [:num_class] and [-1])
    utility_matrix: (num_set, num_class)
    returns:        (B, num_set) float32
    """
    num_set, num_class = utility_matrix.shape
    B = inputs.shape[0]
    K = num_class + 1

    # ---- one-time weight precompute (outside the grid loop) ----------------
    u32 = utility_matrix.astype(jnp.float32)
    omega_coef = nu * jnp.max(u32, axis=1) + (1.0 - nu) * jnp.min(u32, axis=1)  # (num_set,)
    w_aug = jnp.concatenate([u32, omega_coef[:, None]], axis=1)                 # (num_set, K)

    Sp = _round_up(num_set, 8)      # sublane pad only (e.g. 3 -> 8), NOT 128 lanes
    Kp = _round_up(K, 8)
    w_aug = jnp.pad(w_aug, ((0, Sp - num_set), (0, Kp - K)))                    # (Sp, Kp), tiny

    # ---- activations: skip redundant copies --------------------------------
    if inputs.shape[1] == K:
        x = inputs                                   # concat would be an identity copy
    else:
        x = jnp.concatenate([inputs[:, :num_class], inputs[:, -1:]], axis=-1)
    x = x.astype(jnp.float32)

    # ---- batch tiling: batch lives on the 128-lane axis ---------------------
    tm_cap = max(128, (int(tm) // 128) * 128)        # lane-aligned row-tile cap
    n_tiles = pl.cdiv(B, tm_cap)
    if n_tiles == 1 and B >= 256:
        n_tiles = 2                                  # keep both v7x TensorCores busy
    tm_eff = _round_up(pl.cdiv(B, n_tiles), 128)     # tile-size-aware padding (small tail)
    Bp = n_tiles * tm_eff

    # Single fused transpose+pad of the activations: (B, K) -> (Kp, Bp).
    xT = jnp.pad(x.T, ((0, Kp - K), (0, Bp - B)))

    outT = pl.pallas_call(
        utility_kernel,
        out_shape=jax.ShapeDtypeStruct((Sp, Bp), jnp.float32),
        grid_spec=pltpu.PrefetchScalarGridSpec(
            num_scalar_prefetch=0,
            grid=(n_tiles,),
            in_specs=[
                pl.BlockSpec((Sp, Kp), lambda i: (0, 0)),       # resident W_aug
                pl.BlockSpec((Kp, tm_eff), lambda i: (0, i)),   # activation tile
            ],
            out_specs=pl.BlockSpec((Sp, tm_eff), lambda i: (0, i)),
        ),
        compiler_params=pltpu.CompilerParams(
            dimension_semantics=("parallel",)),
    )(w_aug, xT)

    # Tiny (num_set, B) -> (B, num_set) un-transpose / un-pad in the wrapper.
    return outT[:num_set, :B].T


def dm_set_test_ref(inputs, utility_matrix, nu):
    """Pure-JAX reference mirroring the PyTorch loop literally."""
    num_set, num_class = utility_matrix.shape
    cols = []
    for i in range(num_set):
        precise = jnp.sum(inputs[:, :num_class] * utility_matrix[i],
                          axis=-1, keepdims=True)
        omega_1 = inputs[:, -1] * jnp.max(utility_matrix[i])
        omega_2 = inputs[:, -1] * jnp.min(utility_matrix[i])
        omega = (nu * omega_1 + (1.0 - nu) * omega_2)[:, None].astype(jnp.float32)
        cols.append(precise + omega)
    return jnp.concatenate(cols, axis=-1)


if __name__ == "__main__":
    num_class = 4
    num_set = 3
    nu = 0.5
    batch = 8

    key = jax.random.PRNGKey(0)
    k_w, k_x = jax.random.split(key)

    # Deterministic "nn.Linear(in=num_class, out=num_set, bias=False).weight":
    # uniform(-1/sqrt(num_class), 1/sqrt(num_class)), shape (num_set, num_class).
    bound = 1.0 / math.sqrt(num_class)
    utility_matrix = jax.random.uniform(
        k_w, (num_set, num_class), dtype=jnp.float32, minval=-bound, maxval=bound)

    # Inputs: mass vectors (m_1..m_C, m_Omega) -> (batch, num_class + 1).
    logits = jax.random.normal(k_x, (batch, num_class + 1), dtype=jnp.float32)
    inputs = jax.nn.softmax(logits, axis=-1)

    fwd = jax.jit(lambda x, u: dm_set_test_forward(x, u, nu))
    out = jax.block_until_ready(fwd(inputs, utility_matrix))

    ref = dm_set_test_ref(inputs, utility_matrix, nu)
    assert out.shape == (batch, num_set), out.shape
    assert jnp.allclose(out, ref, atol=1e-5, rtol=1e-5), float(jnp.max(jnp.abs(out - ref)))

    print("KERNEL_OK")
</pallas_src>

<mosaic_0001>
module attributes {stable_mosaic.version = 11 : i64} {
  func.func @utility_kernel(%arg0: i32, %arg1: memref<8x8xf32, #tpu.memory_space<vmem>>, %arg2: memref<8x128xf32, #tpu.memory_space<vmem>>, %arg3: memref<8x128xf32, #tpu.memory_space<vmem>>) attributes {dimension_semantics = [#tpu.dimension_semantics<parallel>], iteration_bounds = array<i64: 1>, scalar_prefetch = 0 : i64, scratch_operands = 0 : i64, tpu.core_type = #tpu.core_type<tc>, window_params = [{pipeline_mode = #tpu.pipeline_mode<synchronous>, transform_indices = @transform_0, window_bounds = array<i64: 8, 8>}, {transform_indices = @transform_1, window_bounds = array<i64: 8, 128>}, {transform_indices = @transform_2, window_bounds = array<i64: 8, 128>}]} {
    %c0 = arith.constant 0 : index
    %c0_0 = arith.constant 0 : index
    %0 = vector.load %arg1[%c0, %c0_0] : memref<8x8xf32, #tpu.memory_space<vmem>>, vector<8x8xf32>
    %c0_1 = arith.constant 0 : index
    %c0_2 = arith.constant 0 : index
    %1 = vector.load %arg2[%c0_1, %c0_2] : memref<8x128xf32, #tpu.memory_space<vmem>>, vector<8x128xf32>
    %cst = arith.constant dense<0.000000e+00> : vector<8x128xf32>
    %2 = tpu.matmul %0, %1, %cst {dimension_numbers = #tpu.dot_dimension_numbers<[1], [0], [0], [1], [0, 0, 1, 1], [], []>, precision = #tpu.contract_precision<fp32>} : vector<8x8xf32>, vector<8x128xf32>, vector<8x128xf32> -> vector<8x128xf32>
    %c0_3 = arith.constant 0 : index
    %c0_4 = arith.constant 0 : index
    %3 = vector.load %arg3[%c0_3, %c0_4] : memref<8x128xf32, #tpu.memory_space<vmem>>, vector<8x128xf32>
    tpu.vector_store %arg3[%c0_3, %c0_4], %2 {strides = array<i32>} : memref<8x128xf32, #tpu.memory_space<vmem>>, vector<8x128xf32>,
    return
  }
  func.func @transform_0(%arg0: i32) -> (i32, i32) {
    %c0_i32 = arith.constant 0 : i32
    %c0_i32_0 = arith.constant 0 : i32
    %c0_i32_1 = arith.constant 0 : i32
    return %c0_i32, %c0_i32_0 : i32, i32
  }
  func.func @transform_1(%arg0: i32) -> (i32, i32) {
    %c0_i32 = arith.constant 0 : i32
    %c0_i32_0 = arith.constant 0 : i32
    return %c0_i32, %arg0 : i32, i32
  }
  func.func @transform_2(%arg0: i32) -> (i32, i32) {
    %c0_i32 = arith.constant 0 : i32
    %c0_i32_0 = arith.constant 0 : i32
    return %c0_i32, %arg0 : i32, i32
  }
}

</mosaic_0001>

<bundles_post_ra>
// kernel: _lambda_.1
= control target key start
LH: loop header
LB: loop body
LE: loop exit
PB: predicated region body
PF: predicated region fallthrough
CT: control target
= control target key end

     0   :  { %vm13_vm0 = vcmask 64512   ;;  %s192_s1 = inlined_call_operand.vmem [shape: f32[8,128], index: 1, kind: input, shape index: {}]   ;;  %s193_s0 = inlined_call_operand.vmem [shape: f32[8,8], index: 0, kind: input, shape index: {}]   ;;  %s194_s2 = inlined_call_operand.vmem [shape: f32[8,128], index: 2, kind: output, shape index: {}]  }
   0x1   :  { %v12_v0 = vld [vmem:[%s192_s1] sm:$0xff] }
   0x2   :  { %v11_v1 = vld [vmem:[%s193_s0] sm:$0xff]  ;;  %v32_v2 = vand.u32 4294901760, %v12_v0 }
   0x3   :  { %v15_v3 = vsel %vm13_vm0, %v11_v1, 0 }
   0x4   :  { %v34_v4 = vand.u32 4294901760, %v15_v3  ;;  %v59_v5 = vsub.f32 %v12_v0, %v32_v2  ;;  %109 = vmatpush.msra.mxu3 %v32_v2  ;;  %33 = vmatpush.msra.mxu0 %v32_v2 }
   0x6   :  { %v35_v6 = vsub.f32 %v15_v3, %v34_v4  ;;  %86 = vmatpush.msra.mxu2 %v59_v5  ;;  %v60_v7 = vand.u32 4294901760, %v59_v5 }
   0x8   :  { %89 = vmatmul.f32.vlgmr.msra.gmra.mxu2 %v35_v6  ;;  %v36_v8 = vand.u32 4294901760, %v35_v6  ;;  %v61_v9 = vsub.f32 %v59_v5, %v60_v7  ;;  %135 = vmatpush.msrb.mxu0 %v60_v7 }
   0xa   :  { %113 = vmatmul.f32.vlgmr.msra.gmra.mxu3 %v36_v8  ;;  %v37_v10 = vsub.f32 %v35_v6, %v36_v8  ;;  %v62_v11 = vand.u32 4294901760, %v61_v9 }
   0xc   :  { %v38_v12 = vand.u32 4294901760, %v37_v10  ;;  %63 = vmatpush.msra.mxu1 %v62_v11 }
   0xd   :  { %65 = vmatmul.f32.vlgmr.msra.gmra.mxu1 %v34_v4 }
   0xe   :  { %39 = vmatmul.f32.vlgmr.msra.gmra.mxu0 %v38_v12  ;;  %157 = vmatpush.msrb.mxu1 %v32_v2 }
  0x15   :  { %159 = vmatmul.f32.vlgmr.msrb.gmra.mxu1 %v34_v4 }
  0x16   :  { %137 = vmatmul.f32.vlgmr.msrb.gmra.mxu0 %v34_v4 }
  0x8a   :  { %v66_v14 = vpop.f32.mrf.mxu1 }
  0x8b   :  { %v40_v13 = vpop.f32.mrf.mxu0  ;;  %v90_v16 = vpop.f32.mrf.mxu2 }
  0x8c   :  { %v67_v15 = vadd.f32 %v66_v14, %v40_v13 }
  0x8d   :  { %v114_v18 = vpop.f32.mrf.mxu3 }
  0x8e   :  { %v91_v17 = vadd.f32 %v90_v16, %v67_v15 }
  0x90   :  { %v115_v19 = vadd.f32 %v114_v18, %v91_v17 }
  0x92   :  { %v160_v21 = vpop.f32.mrf.mxu1 }
  0x93   :  { %v138_v20 = vpop.f32.mrf.mxu0 }
  0x94   :  { %v139_v22 = vadd.f32 %v138_v20, %v115_v19 }
  0x96   :  { %v161_v23 = vadd.f32 %v160_v21, %v139_v22 }
  0x98   :  { %163 = vst [vmem:[%s194_s2] sm:$0xff] %v161_v23 }

</bundles_post_ra>
